<compile_context>
chip_gen: v5e
topology: v5e:2x2
jax: 0.10.0
libtpu: 0.0.40
codegen_flags: <defaults>
</compile_context>

<pallas_src>
import jax
import jax.numpy as jnp
from jax.experimental import pallas as pl
from jax.experimental.pallas import tpu as pltpu
import numpy as np

LANE = 128        # vreg lane width
NEG_BIG = -1e30   # finite "minus infinity" folded into the fc3 bias padding


def _round_up(x, m):
    return ((x + m - 1) // m) * m


def _trpo_kernel(x_ref, w1_ref, b1_ref, w2_ref, b2_ref, w3_ref, b3_ref, o_ref):
    """Fused MLP + log_softmax. Padded action lanes carry a -1e30 bias, so no
    in-kernel masking is needed: exp() underflows them to exactly zero."""
    x = x_ref[...]                                           # [TM, state_dim]

    # fc1 + relu  -> [TM, 128] (lane-dense)
    h1 = jnp.dot(x, w1_ref[...], preferred_element_type=jnp.float32)
    h1 = jnp.maximum(h1 + b1_ref[...], 0.0)

    # fc2 + relu  -> [TM, 128] (cols >= hidden are zero-padded -> stay 0)
    h2 = jnp.dot(h1, w2_ref[...], preferred_element_type=jnp.float32)
    h2 = jnp.maximum(h2 + b2_ref[...], 0.0)

    # fc3         -> [TM, ACT_PAD]; padded cols get bias NEG_BIG
    logits = jnp.dot(h2, w3_ref[...], preferred_element_type=jnp.float32)
    logits = logits + b3_ref[...]

    # numerically stable log_softmax along the action axis (padded lanes
    # contribute exp(NEG_BIG - m) == 0 to the sum)
    m = jnp.max(logits, axis=-1, keepdims=True)
    shifted = logits - m
    lse = jnp.log(jnp.sum(jnp.exp(shifted), axis=-1, keepdims=True))
    o_ref[...] = (shifted - lse).astype(o_ref.dtype)


def trpo_log_probs(states, params, *, tm_max=2048):
    """states: [B, state_dim] float32 -> log-probs [B, n_actions] float32."""
    w1, b1, w2, b2, w3, b3 = params
    B, state_dim = states.shape
    hidden = w2.shape[1]
    n_actions = w3.shape[1]
    act_pad = max(8, _round_up(n_actions, 8))      # narrow, padded action width

    # ---- padded weights / biases -----------------------------------------
    # fc2 padded to 128 output lanes so h2 stays lane-dense for the fc3 matmul.
    w2p = jnp.pad(w2, ((0, 0), (0, LANE - hidden)))                   # [128,128]
    b2p = jnp.pad(b2, ((0, 0), (0, LANE - hidden)))                   # [1,128]
    # fc3 padded only to act_pad lanes; the action mask is folded into the bias.
    w3p = jnp.pad(w3, ((0, LANE - hidden), (0, act_pad - n_actions)))  # [128,8]
    b3p = jnp.pad(b3, ((0, 0), (0, act_pad - n_actions)),
                  constant_values=NEG_BIG)                             # [1,8]

    # ---- batch tiling (no batch padding; partial last block via cdiv) -----
    if B <= tm_max:
        tm = B                       # single tile: block == full array dims
        grid_len = 1
    else:
        # even tile count so the 'parallel' batch axis balances across the two
        # TensorCores on v7x (no-op on single-TC v5e/v6e)
        ntiles = _round_up(pl.cdiv(B, tm_max), 2)
        tm = _round_up(pl.cdiv(B, ntiles), 8)
        grid_len = pl.cdiv(B, tm)

    # weights/biases stay resident across the batch grid (DMA'd once)
    def resident(shape):
        return pl.BlockSpec(shape, lambda i: (0, 0))

    in_specs = [
        pl.BlockSpec((tm, state_dim), lambda i: (i, 0)),   # states tile
        resident((state_dim, LANE)),                        # w1
        resident((1, LANE)),                                # b1
        resident((LANE, LANE)),                             # w2 (padded)
        resident((1, LANE)),                                # b2 (padded)
        resident((LANE, act_pad)),                          # w3 (padded)
        resident((1, act_pad)),                             # b3 (mask folded in)
    ]
    out_specs = pl.BlockSpec((tm, act_pad), lambda i: (i, 0))

    cost = pl.CostEstimate(
        flops=2 * B * (state_dim * LANE + LANE * LANE + LANE * act_pad),
        transcendentals=B * (act_pad + 1),                  # exps + log per row
        bytes_accessed=4 * (B * state_dim + B * act_pad
                            + state_dim * LANE + LANE * LANE + LANE * act_pad
                            + 2 * LANE + act_pad),
    )

    out_padded = pl.pallas_call(
        _trpo_kernel,
        out_shape=jax.ShapeDtypeStruct((B, act_pad), jnp.float32),
        grid=(grid_len,),
        in_specs=in_specs,
        out_specs=out_specs,
        compiler_params=pltpu.CompilerParams(
            dimension_semantics=("parallel",)),
        cost_estimate=cost,
    )(states, w1, b1, w2p, b2p, w3p, b3p)

    # drop the (at most 5) padded action lanes; no batch rows to strip
    return out_padded[:, :n_actions]


def init_params(key, state_dim, n_actions, hidden_size=32):
    """PyTorch-style Linear init: U(-1/sqrt(fan_in), 1/sqrt(fan_in)).

    Weights returned pre-transposed to [in, out]; biases as [1, out].
    """
    dims = [(state_dim, 128), (128, hidden_size), (hidden_size, n_actions)]
    params = []
    for (fan_in, fan_out) in dims:
        key, kw, kb = jax.random.split(key, 3)
        bound = 1.0 / np.sqrt(fan_in)
        w = jax.random.uniform(kw, (fan_in, fan_out), jnp.float32, -bound, bound)
        b = jax.random.uniform(kb, (1, fan_out), jnp.float32, -bound, bound)
        params += [w, b]
    return tuple(params)


def _reference_log_probs(states, params):
    """Plain-JAX reference for a correctness check."""
    w1, b1, w2, b2, w3, b3 = params
    h1 = jnp.maximum(states @ w1 + b1, 0.0)
    h2 = jnp.maximum(h1 @ w2 + b2, 0.0)
    logits = h2 @ w3 + b3
    return jax.nn.log_softmax(logits, axis=-1)


if __name__ == "__main__":
    key = jax.random.PRNGKey(0)

    state_dim = 6      # Acrobot-v1 observation_space.shape[0]
    n_actions = 3      # Acrobot-v1 action_space.n
    hidden_size = 32
    batch = 8

    k_params, k_states = jax.random.split(key)
    params = init_params(k_params, state_dim, n_actions, hidden_size)
    states = jax.random.normal(k_states, (batch, state_dim), jnp.float32)

    fwd = jax.jit(trpo_log_probs)
    log_probs = fwd(states, params)
    jax.block_until_ready(log_probs)

    # sanity: match pure-JAX reference and sum(exp(log_probs)) == 1
    ref = _reference_log_probs(states, params)
    np.testing.assert_allclose(np.asarray(log_probs), np.asarray(ref),
                               rtol=1e-5, atol=1e-5)
    np.testing.assert_allclose(np.exp(np.asarray(log_probs)).sum(axis=-1),
                               np.ones(batch), rtol=1e-5, atol=1e-5)

    # single-tile path with a batch that is not a multiple of 8
    mid_states = jax.random.normal(jax.random.PRNGKey(1), (1031, state_dim),
                                   jnp.float32)
    mid_out = fwd(mid_states, params)
    jax.block_until_ready(mid_out)
    np.testing.assert_allclose(np.asarray(mid_out),
                               np.asarray(_reference_log_probs(mid_states, params)),
                               rtol=1e-5, atol=1e-5)

    # multi-tile path with an even grid and a partial last block
    big_states = jax.random.normal(jax.random.PRNGKey(2), (5000, state_dim),
                                   jnp.float32)
    big_out = fwd(big_states, params)
    jax.block_until_ready(big_out)
    np.testing.assert_allclose(np.asarray(big_out),
                               np.asarray(_reference_log_probs(big_states, params)),
                               rtol=1e-5, atol=1e-5)

    print("KERNEL_OK")
</pallas_src>

<mosaic_0001>
module attributes {stable_mosaic.version = 11 : i64} {
  func.func @_trpo_kernel(%arg0: i32, %arg1: memref<8x6xf32, #tpu.memory_space<vmem>>, %arg2: memref<6x128xf32, #tpu.memory_space<vmem>>, %arg3: memref<1x128xf32, #tpu.memory_space<vmem>>, %arg4: memref<128x128xf32, #tpu.memory_space<vmem>>, %arg5: memref<1x128xf32, #tpu.memory_space<vmem>>, %arg6: memref<128x8xf32, #tpu.memory_space<vmem>>, %arg7: memref<1x8xf32, #tpu.memory_space<vmem>>, %arg8: memref<8x8xf32, #tpu.memory_space<vmem>>) attributes {dimension_semantics = [#tpu.dimension_semantics<parallel>], iteration_bounds = array<i64: 1>, scalar_prefetch = 0 : i64, scratch_operands = 0 : i64, tpu.core_type = #tpu.core_type<tc>, window_params = [{transform_indices = @transform_0, window_bounds = array<i64: 8, 6>}, {pipeline_mode = #tpu.pipeline_mode<synchronous>, transform_indices = @transform_1, window_bounds = array<i64: 6, 128>}, {pipeline_mode = #tpu.pipeline_mode<synchronous>, transform_indices = @transform_2, window_bounds = array<i64: 1, 128>}, {pipeline_mode = #tpu.pipeline_mode<synchronous>, transform_indices = @transform_3, window_bounds = array<i64: 128, 128>}, {pipeline_mode = #tpu.pipeline_mode<synchronous>, transform_indices = @transform_4, window_bounds = array<i64: 1, 128>}, {pipeline_mode = #tpu.pipeline_mode<synchronous>, transform_indices = @transform_5, window_bounds = array<i64: 128, 8>}, {pipeline_mode = #tpu.pipeline_mode<synchronous>, transform_indices = @transform_6, window_bounds = array<i64: 1, 8>}, {transform_indices = @transform_7, window_bounds = array<i64: 8, 8>}]} {
    %c0 = arith.constant 0 : index
    %c0_0 = arith.constant 0 : index
    %0 = vector.load %arg1[%c0, %c0_0] : memref<8x6xf32, #tpu.memory_space<vmem>>, vector<8x6xf32>
    %c0_1 = arith.constant 0 : index
    %c0_2 = arith.constant 0 : index
    %1 = vector.load %arg2[%c0_1, %c0_2] : memref<6x128xf32, #tpu.memory_space<vmem>>, vector<6x128xf32>
    %cst = arith.constant dense<0.000000e+00> : vector<8x128xf32>
    %2 = tpu.matmul %0, %1, %cst {dimension_numbers = #tpu.dot_dimension_numbers<[1], [0], [0], [1], [0, 0, 1, 1], [], []>} : vector<8x6xf32>, vector<6x128xf32>, vector<8x128xf32> -> vector<8x128xf32>
    %c0_3 = arith.constant 0 : index
    %c0_4 = arith.constant 0 : index
    %3 = vector.load %arg3[%c0_3, %c0_4] : memref<1x128xf32, #tpu.memory_space<vmem>>, vector<1x128xf32>
    %4 = vector.broadcast %3 : vector<1x128xf32> to vector<8x128xf32>
    %5 = arith.addf %2, %4 : vector<8x128xf32>
    %cst_5 = arith.constant 0.000000e+00 : f32
    %6 = vector.broadcast %cst_5 : f32 to vector<8x128xf32>
    %7 = arith.maximumf %5, %6 : vector<8x128xf32>
    %c0_6 = arith.constant 0 : index
    %c0_7 = arith.constant 0 : index
    %8 = vector.load %arg4[%c0_6, %c0_7] : memref<128x128xf32, #tpu.memory_space<vmem>>, vector<128x128xf32>
    %cst_8 = arith.constant dense<0.000000e+00> : vector<8x128xf32>
    %9 = tpu.matmul %7, %8, %cst_8 {dimension_numbers = #tpu.dot_dimension_numbers<[1], [0], [0], [1], [0, 0, 1, 1], [], []>} : vector<8x128xf32>, vector<128x128xf32>, vector<8x128xf32> -> vector<8x128xf32>
    %c0_9 = arith.constant 0 : index
    %c0_10 = arith.constant 0 : index
    %10 = vector.load %arg5[%c0_9, %c0_10] : memref<1x128xf32, #tpu.memory_space<vmem>>, vector<1x128xf32>
    %11 = vector.broadcast %10 : vector<1x128xf32> to vector<8x128xf32>
    %12 = arith.addf %9, %11 : vector<8x128xf32>
    %cst_11 = arith.constant 0.000000e+00 : f32
    %13 = vector.broadcast %cst_11 : f32 to vector<8x128xf32>
    %14 = arith.maximumf %12, %13 : vector<8x128xf32>
    %c0_12 = arith.constant 0 : index
    %c0_13 = arith.constant 0 : index
    %15 = vector.load %arg6[%c0_12, %c0_13] : memref<128x8xf32, #tpu.memory_space<vmem>>, vector<128x8xf32>
    %cst_14 = arith.constant dense<0.000000e+00> : vector<8x8xf32>
    %16 = tpu.matmul %14, %15, %cst_14 {dimension_numbers = #tpu.dot_dimension_numbers<[1], [0], [0], [1], [0, 0, 1, 1], [], []>} : vector<8x128xf32>, vector<128x8xf32>, vector<8x8xf32> -> vector<8x8xf32>
    %c0_15 = arith.constant 0 : index
    %c0_16 = arith.constant 0 : index
    %17 = vector.load %arg7[%c0_15, %c0_16] : memref<1x8xf32, #tpu.memory_space<vmem>>, vector<1x8xf32>
    %18 = vector.broadcast %17 : vector<1x8xf32> to vector<8x8xf32>
    %19 = arith.addf %16, %18 : vector<8x8xf32>
    %cst_17 = arith.constant dense<0xFF800000> : vector<8xf32>
    %20 = vector.multi_reduction <maximumf>, %19, %cst_17 [1] : vector<8x8xf32> to vector<8xf32>
    %21 = vector.shape_cast %20 : vector<8xf32> to vector<8x1xf32>
    %22 = vector.broadcast %21 : vector<8x1xf32> to vector<8x8xf32>
    %23 = arith.subf %19, %22 : vector<8x8xf32>
    %24 = math.exp %23 : vector<8x8xf32>
    %cst_18 = arith.constant dense<0.000000e+00> : vector<8xf32>
    %25 = vector.multi_reduction <add>, %24, %cst_18 [1] : vector<8x8xf32> to vector<8xf32>
    %26 = vector.shape_cast %25 : vector<8xf32> to vector<8x1xf32>
    %27 = math.log %26 : vector<8x1xf32>
    %28 = vector.broadcast %27 : vector<8x1xf32> to vector<8x8xf32>
    %29 = arith.subf %23, %28 : vector<8x8xf32>
    %c0_19 = arith.constant 0 : index
    %c0_20 = arith.constant 0 : index
    %30 = vector.load %arg8[%c0_19, %c0_20] : memref<8x8xf32, #tpu.memory_space<vmem>>, vector<8x8xf32>
    tpu.vector_store %arg8[%c0_19, %c0_20], %29 {strides = array<i32>} : memref<8x8xf32, #tpu.memory_space<vmem>>, vector<8x8xf32>,
    return
  }
  func.func @transform_0(%arg0: i32) -> (i32, i32) {
    %c0_i32 = arith.constant 0 : i32
    %c0_i32_0 = arith.constant 0 : i32
    return %arg0, %c0_i32 : i32, i32
  }
  func.func @transform_1(%arg0: i32) -> (i32, i32) {
    %c0_i32 = arith.constant 0 : i32
    %c0_i32_0 = arith.constant 0 : i32
    %c0_i32_1 = arith.constant 0 : i32
    return %c0_i32, %c0_i32_0 : i32, i32
  }
  func.func @transform_2(%arg0: i32) -> (i32, i32) {
    %c0_i32 = arith.constant 0 : i32
    %c0_i32_0 = arith.constant 0 : i32
    %c0_i32_1 = arith.constant 0 : i32
    return %c0_i32, %c0_i32_0 : i32, i32
  }
  func.func @transform_3(%arg0: i32) -> (i32, i32) {
    %c0_i32 = arith.constant 0 : i32
    %c0_i32_0 = arith.constant 0 : i32
    %c0_i32_1 = arith.constant 0 : i32
    return %c0_i32, %c0_i32_0 : i32, i32
  }
  func.func @transform_4(%arg0: i32) -> (i32, i32) {
    %c0_i32 = arith.constant 0 : i32
    %c0_i32_0 = arith.constant 0 : i32
    %c0_i32_1 = arith.constant 0 : i32
    return %c0_i32, %c0_i32_0 : i32, i32
  }
  func.func @transform_5(%arg0: i32) -> (i32, i32) {
    %c0_i32 = arith.constant 0 : i32
    %c0_i32_0 = arith.constant 0 : i32
    %c0_i32_1 = arith.constant 0 : i32
    return %c0_i32, %c0_i32_0 : i32, i32
  }
  func.func @transform_6(%arg0: i32) -> (i32, i32) {
    %c0_i32 = arith.constant 0 : i32
    %c0_i32_0 = arith.constant 0 : i32
    %c0_i32_1 = arith.constant 0 : i32
    return %c0_i32, %c0_i32_0 : i32, i32
  }
  func.func @transform_7(%arg0: i32) -> (i32, i32) {
    %c0_i32 = arith.constant 0 : i32
    %c0_i32_0 = arith.constant 0 : i32
    return %arg0, %c0_i32 : i32, i32
  }
}

</mosaic_0001>

<bundles_post_ra>
// kernel: trpo_log_probs.1
= control target key start
LH: loop header
LB: loop body
LE: loop exit
PB: predicated region body
PF: predicated region fallthrough
CT: control target
= control target key end

     0   :  { %vm36_vm0 = vcmask 1045504   ;;  %vm32_vm1 = vcmask 48128   ;;  %vm142_vm2 = vcmask 64512   ;;  %s326_s1 = inlined_call_operand.vmem [shape: f32[6,128], index: 1, kind: input, shape index: {}]   ;;  %s327_s0 = inlined_call_operand.vmem [shape: f32[8,6], index: 0, kind: input, shape index: {}]   ;;  %s328_s3 = inlined_call_operand.vmem [shape: f32[128,128], index: 3, kind: input, shape index: {}]   ;;  %s329_s2 = inlined_call_operand.vmem [shape: f32[1,128], index: 2, kind: input, shape index: {}]   ;;  %s330_s4 = inlined_call_operand.vmem [shape: f32[1,128], index: 4, kind: input, shape index: {}]   ;;  %s331_s5 = inlined_call_operand.vmem [shape: f32[128,8], index: 5, kind: input, shape index: {}]   ;;  %s332_s6 = inlined_call_operand.vmem [shape: f32[1,8], index: 6, kind: input, shape index: {}]   ;;  %s333_s7 = inlined_call_operand.vmem [shape: f32[8,8], index: 7, kind: output, shape index: {}]  }
   0x1   :  { %v27_v0 = vld [vmem:[%s326_s1] sm:$0x3f]  ;;  %v76_v2 = vld [vmem:[%s328_s3 + $0x78] sm:$0xff]  ;;  %v75_v3 = vld [vmem:[%s328_s3 + $0x70] sm:$0xff] }
   0x2   :  { %v26_v1 = vld [vmem:[%s327_s0] sm:$0xff]  ;;  %160 = vmatpush.msk.msra.mxu0 %vm36_vm0, %v27_v0  ;;  %81 = vmatpush.msra.mxu1 %v76_v2  ;;  %v74_v4 = vld [vmem:[%s328_s3 + $0x68] sm:$0xff]  ;;  %v72_v6 = vld [vmem:[%s328_s3 + $0x58] sm:$0xff] }
   0x3   :  { %161 = vmatmul.msk.f32.vlgmr.msra.gmra.mxu0 %vm32_vm1, %v26_v1  ;;  %v73_v5 = vld [vmem:[%s328_s3 + $0x60] sm:$0xff]  ;;  %v71_v7 = vld [vmem:[%s328_s3 + $0x50] sm:$0xff]  ;;  %v70_v8 = vld [vmem:[%s328_s3 + $0x48] sm:$0xff] }
   0x4   :  { %82 = vmatpush.msra.mxu1 %v75_v3  ;;  %v69_v9 = vld [vmem:[%s328_s3 + $0x40] sm:$0xff]  ;;  %v68_v10 = vld [vmem:[%s328_s3 + $0x38] sm:$0xff]  ;;  %v67_v11 = vld [vmem:[%s328_s3 + $0x30] sm:$0xff] }
   0x5   :  { %v66_v12 = vld [vmem:[%s328_s3 + $0x28] sm:$0xff]  ;;  %v65_v13 = vld [vmem:[%s328_s3 + $0x20] sm:$0xff]  ;;  %v64_v14 = vld [vmem:[%s328_s3 + $0x18] sm:$0xff] }
   0x6   :  { %83 = vmatpush.msra.mxu1 %v74_v4  ;;  %v63_v15 = vld [vmem:[%s328_s3 + $0x10] sm:$0xff]  ;;  %v62_v16 = vld [vmem:[%s328_s3 + $0x8] sm:$0xff]  ;;  %v61_v17 = vld [vmem:[%s328_s3] sm:$0xff] }
   0x7   :  { %v117_v18 = vld [vmem:[%s331_s5 + $0x78] sm:$0xff]  ;;  %v116_v19 = vld [vmem:[%s331_s5 + $0x70] sm:$0xff]  ;;  %v115_v20 = vld [vmem:[%s331_s5 + $0x68] sm:$0xff] }
   0x8   :  { %84 = vmatpush.msra.mxu1 %v73_v5  ;;  %122 = vmatpush.msra.mxu2 %v117_v18  ;;  %v114_v21 = vld [vmem:[%s331_s5 + $0x60] sm:$0xff]  ;;  %v113_v22 = vld [vmem:[%s331_s5 + $0x58] sm:$0xff]  ;;  %v112_v23 = vld [vmem:[%s331_s5 + $0x50] sm:$0xff] }
   0x9   :  { %v111_v24 = vld [vmem:[%s331_s5 + $0x48] sm:$0xff]  ;;  %v110_v25 = vld [vmem:[%s331_s5 + $0x40] sm:$0xff]  ;;  %v109_v26 = vld [vmem:[%s331_s5 + $0x38] sm:$0xff] }
   0xa   :  { %85 = vmatpush.msra.mxu1 %v72_v6  ;;  %123 = vmatpush.msra.mxu2 %v116_v19  ;;  %v108_v27 = vld [vmem:[%s331_s5 + $0x30] sm:$0xff]  ;;  %v107_v28 = vld [vmem:[%s331_s5 + $0x28] sm:$0xff]  ;;  %v106_v29 = vld [vmem:[%s331_s5 + $0x20] sm:$0xff] }
   0xb   :  { %v105_v30 = vld [vmem:[%s331_s5 + $0x18] sm:$0xff]  ;;  %v162_v31 = vld [vmem:[%s329_s2] ss:$0 sm:$0xff]  ;;  %v104_v35 = vld [vmem:[%s331_s5 + $0x10] sm:$0xff] }
   0xc   :  { %86 = vmatpush.msra.mxu1 %v71_v7  ;;  %124 = vmatpush.msra.mxu2 %v115_v20  ;;  %v103_v36 = vld [vmem:[%s331_s5 + $0x8] sm:$0xff]  ;;  %v102_v37 = vld [vmem:[%s331_s5] sm:$0xff] }
   0xd   :  { %v163_v38 = vld [vmem:[%s330_s4] ss:$0 sm:$0xff] }
   0xe   :  { %87 = vmatpush.msra.mxu1 %v70_v8  ;;  %125 = vmatpush.msra.mxu2 %v114_v21  ;;  %v164_v42 = vld [vmem:[%s332_s6] ss:$0 sm:$0xff] }
  0x10   :  { %88 = vmatpush.msra.mxu1 %v69_v9  ;;  %126 = vmatpush.msra.mxu2 %v113_v22 }
  0x12   :  { %89 = vmatpush.msra.mxu1 %v68_v10  ;;  %127 = vmatpush.msra.mxu2 %v112_v23 }
  0x14   :  { %90 = vmatpush.msra.mxu1 %v67_v11  ;;  %128 = vmatpush.msra.mxu2 %v111_v24 }
  0x16   :  { %91 = vmatpush.msra.mxu1 %v66_v12  ;;  %129 = vmatpush.msra.mxu2 %v110_v25 }
  0x18   :  { %92 = vmatpush.msra.mxu1 %v65_v13  ;;  %130 = vmatpush.msra.mxu2 %v109_v26 }
  0x1a   :  { %93 = vmatpush.msra.mxu1 %v64_v14  ;;  %131 = vmatpush.msra.mxu2 %v108_v27 }
  0x1c   :  { %94 = vmatpush.msra.mxu1 %v63_v15  ;;  %132 = vmatpush.msra.mxu2 %v107_v28 }
  0x1e   :  { %95 = vmatpush.msra.mxu1 %v62_v16  ;;  %133 = vmatpush.msra.mxu2 %v106_v29 }
  0x20   :  { %96 = vmatpush.msra.mxu1 %v61_v17  ;;  %134 = vmatpush.msra.mxu2 %v105_v30 }
  0x22   :  { %135 = vmatpush.msra.mxu2 %v104_v35 }
  0x24   :  { %136 = vmatpush.msra.mxu2 %v103_v36 }
  0x26   :  { %137 = vmatpush.msra.mxu2 %v102_v37 }
  0x80   :  { %v57_v32 = vpop.f32.mrf.mxu0 }
  0x81   :  { %v58_v33 = vadd.f32 %v162_v31, %v57_v32 }
  0x83   :  { %v60_v34 = vmax.f32 %v58_v33, 0.0 }
  0x85   :  { %97 = vmatmul.f32.vlgmr.msra.gmra.mxu1 %v60_v34 }
 0x102   :  { %v98_v39 = vpop.f32.mrf.mxu1 }
 0x103   :  { %v99_v40 = vadd.f32 %v163_v38, %v98_v39 }
 0x105   :  { %v101_v41 = vmax.f32 %v99_v40, 0.0 }
 0x107   :  { %138 = vmatmul.f32.vlgmr.msra.gmra.mxu2 %v101_v41 }
 0x18a   :  { %v139_v43 = vpop.f32.mrf.mxu2 }
 0x18b   :  { %v140_v44 = vadd.f32 %v164_v42, %v139_v43 }
 0x18d   :  { %v143_v45 = vsel %vm142_vm2, %v140_v44, -inf }
 0x18e   :  { %144 = vmax.xlane.f32.xlu0 %v143_v45 }
 0x201   :  { %v145_v46 = vpop.xlane.xlu0 %144 }
 0x202   :  { %v146_v47 = vsub.f32 %v140_v44, %v145_v46 }
 0x204   :  { %v147_v48 = vmul.f32 1.442695, %v146_v47 }
 0x206   :  { %165 = vpow2.f32 %v147_v48 }
 0x20c   :  { %v166_v49 = vpop.eup %165 }
 0x20d   :  { %v149_v50 = vsel %vm142_vm2, %v166_v49, 0.0 }
 0x20e   :  { %150 = vadd.xlane.f32.xlu0 %v149_v50 }
 0x281   :  { %v151_v51 = vpop.xlane.xlu0 %150 }
 0x282   :  { %167 = vlog2.f32 %v151_v51 }
 0x288   :  { %v168_v52 = vpop.eup %167 }
 0x289   :  { %v153_v53 = vmul.f32 0.6931472, %v168_v52 }
 0x28b   :  { %v154_v54 = vsub.f32 %v146_v47, %v153_v53 }
 0x28d   :  { %155 = vst.msk [vmem:[%s333_s7] sm:$0xff] %vm142_vm2, %v154_v54 }

</bundles_post_ra>
